<compile_context>
chip_gen: v5e
topology: v5e:2x2
jax: 0.10.0
libtpu: 0.0.40
codegen_flags: <defaults>
</compile_context>

<pallas_src>
import jax
import jax.numpy as jnp
import numpy as np
from jax.experimental import pallas as pl
from jax.experimental.pallas import tpu as pltpu

_BN_EPS = 1e-5
_LANE = 128
_SLAB_COLS = 12                  # 3 branches x [w0*s, w1*s, w2*s, shift]
_VMEM_BUDGET = 28 * 2**20        # per-step working-set target (fits v7x 64 MiB with headroom)


def _round_up(t, m):
    return t if t % m == 0 else (t // m + 1) * m


def _make_kernel(Tn, Tm, tbc):
    def kernel(n_ref, m_ref, sel_ref, p_ref, o_ref):
        xn = n_ref[...].astype(jnp.float32)   # (tbc, Wn)
        xm = m_ref[...].astype(jnp.float32)   # (tbc, Wm)
        sel = sel_ref[...]                    # (Wn, Wm) one-hot nearest-neighbour map
        p = p_ref[...]                        # (tbc, 12) packed per-channel params

        def shifts(x, t):
            # +-1 time shifts for the 'same'-padded depthwise conv.  XLU lane rotation;
            # boundary zeros come from the trailing zero-pad lane when the time axis was
            # padded, otherwise from an explicit mask on the wrapped lane (2 VPU selects).
            w = x.shape[-1]
            x_prev = pltpu.roll(x, shift=1, axis=1)       # x_prev[:, j] = x[:, j-1]
            x_next = pltpu.roll(x, shift=w - 1, axis=1)   # x_next[:, j] = x[:, j+1]
            if w == t:   # unpadded time axis -> mask the wrapped boundary lanes
                lane = jax.lax.broadcasted_iota(jnp.int32, x.shape, 1)
                x_prev = jnp.where(lane == 0, 0.0, x_prev)
                x_next = jnp.where(lane == t - 1, 0.0, x_next)
            return x_prev, x_next

        def dwconv_bn(x, x_prev, x_next, col):
            # Depthwise Conv1d(k=3,'same',groups=C) with conv bias + eval-mode BatchNorm
            # folded wrapper-side into the taps (w*scale) and a per-channel shift.
            w0 = p[:, col + 0:col + 1]
            w1 = p[:, col + 1:col + 2]
            w2 = p[:, col + 2:col + 3]
            sh = p[:, col + 3:col + 4]
            return w0 * x_prev + w1 * x + w2 * x_next + sh

        xn_prev, xn_next = shifts(xn, Tn)     # shared by the w1 and w3 branches
        xm_prev, xm_next = shifts(xm, Tm)

        z1 = dwconv_bn(xn, xn_prev, xn_next, 0)
        y1 = 0.5 * jnp.tanh(0.5 * z1) + 0.5   # sigmoid, kept on the EUP slot
        y2 = dwconv_bn(xm, xm_prev, xm_next, 4)
        y3 = dwconv_bn(xn, xn_prev, xn_next, 8)

        # Nearest-neighbour upsample of BOTH n-branches with one MXU pass over sel.
        y13 = jnp.dot(jnp.concatenate([y1, y3], axis=0), sel,
                      preferred_element_type=jnp.float32)
        y1_up = y13[:tbc, :]
        y3_up = y13[tbc:, :]

        o_ref[...] = (y1_up * y2 + y3_up).astype(o_ref.dtype)

    return kernel


def _pick_tb(B, C, Wn, Wm):
    """Batch elements per grid step.

    Valid: tb divides B and tb*C is sublane-aligned (or the block spans the whole array).
    Among tbs whose estimated per-step VMEM working set fits the budget, prefer those
    giving >= 2 grid steps (keeps both v7x TensorCores busy and the DMA pipeline primed),
    then take the largest.
    """
    def est(tb):
        tbc = tb * C
        blocks = 2 * tbc * (Wn + 2 * Wm) * 4             # double-buffered xn/xm/out blocks
        resident = 2 * (Wn * Wm + tbc * _SLAB_COLS) * 4  # sel + params slab (double-buffered)
        temps = tbc * (4 * Wn + 4 * Wm) * 4              # in-kernel f32 temporaries (rough)
        return blocks + resident + temps

    valid = [tb for tb in range(1, B + 1)
             if B % tb == 0 and (tb == B or (tb * C) % 8 == 0)]
    fitting = [tb for tb in valid if est(tb) <= _VMEM_BUDGET]
    pool = fitting if fitting else [min(valid)]
    multi = [tb for tb in pool if B // tb >= 2]
    if multi:
        pool = multi
    tb = max(pool)
    return tb, est(tb)


def tfar_forward(tensor_m, tensor_n, params):
    """tensor_m: (B, C, Tm), tensor_n: (B, C, Tn) -> (B, C, Tm).  Eval-mode BatchNorm."""
    B, C, Tm = tensor_m.shape
    Bn, Cn, Tn = tensor_n.shape
    assert B == Bn and C == Cn

    Wm = _round_up(Tm, _LANE)
    Wn = _round_up(Tn, _LANE)
    tb, est_bytes = _pick_tb(B, C, Wn, Wm)
    tbc = tb * C

    # Flatten batch*channel onto sublanes (free reshape).  Pad the time axis only when
    # needed; dtype conversion happens in-kernel (no wrapper astype round trip).
    xm = tensor_m.reshape(B * C, Tm)
    xn = tensor_n.reshape(B * C, Tn)
    if Wm != Tm:
        xm = jnp.pad(xm, ((0, 0), (0, Wm - Tm)))
    if Wn != Tn:
        xn = jnp.pad(xn, ((0, 0), (0, Wn - Tn)))

    # PyTorch F.interpolate(mode='nearest'): src = floor(dst * Tn / Tm).
    # Padded dst columns / padded src rows are zero, so padded lanes of the n-branches
    # never reach valid output and padded output lanes are exactly 0.
    dst = jnp.arange(Wm)
    src = (dst * Tn) // Tm
    sel = ((src[None, :] == jnp.arange(Wn)[:, None]) &
           (dst < Tm)[None, :]).astype(jnp.float32)              # (Wn, Wm)

    # Pack per-channel params into one slab; conv bias + eval-mode BatchNorm are folded
    # into the taps: per branch [w0*scale, w1*scale, w2*scale, shift].
    cols = []
    for name in ("w1", "w2", "w3"):
        pr = params[name]
        scale = pr["gamma"] / jnp.sqrt(pr["var"] + _BN_EPS)           # (C,)
        shift = scale * (pr["bias"] - pr["mean"]) + pr["beta"]        # (C,)
        cols += [pr["weight"].astype(jnp.float32) * scale[:, None], shift[:, None]]
    slab = jnp.tile(jnp.concatenate(cols, axis=1).astype(jnp.float32), (tb, 1))  # (tbc, 12)

    grid_spec = pltpu.PrefetchScalarGridSpec(
        num_scalar_prefetch=0,
        grid=(B // tb,),
        in_specs=[
            pl.BlockSpec((tbc, Wn), lambda b: (b, 0)),           # tensor_n rows
            pl.BlockSpec((tbc, Wm), lambda b: (b, 0)),           # tensor_m rows
            pl.BlockSpec((Wn, Wm), lambda b: (0, 0)),            # sel (grid-invariant)
            pl.BlockSpec((tbc, _SLAB_COLS), lambda b: (0, 0)),   # packed params (grid-invariant)
        ],
        out_specs=pl.BlockSpec((tbc, Wm), lambda b: (b, 0)),
    )

    out = pl.pallas_call(
        _make_kernel(Tn, Tm, tbc),
        out_shape=jax.ShapeDtypeStruct((B * C, Wm), tensor_m.dtype),
        grid_spec=grid_spec,
        compiler_params=pltpu.CompilerParams(
            dimension_semantics=("parallel",),
            vmem_limit_bytes=int(min(max(2 * est_bytes, 32 * 2**20), 56 * 2**20)),
        ),
    )(xn, xm, sel, slab)

    if Wm != Tm:
        out = out[:, :Tm]        # slice only when the time axis had to be padded
    return out.reshape(B, C, Tm)


# ------------------------- pure-JAX reference ------------------------------
def _ref_branch(x, p):
    w, b = p["weight"], p["bias"]
    xp = jnp.pad(x, ((0, 0), (0, 0), (1, 1)))
    y = (w[None, :, 0, None] * xp[:, :, 0:-2]
         + w[None, :, 1, None] * xp[:, :, 1:-1]
         + w[None, :, 2, None] * xp[:, :, 2:]) + b[None, :, None]
    y = (y - p["mean"][None, :, None]) / jnp.sqrt(p["var"] + _BN_EPS)[None, :, None]
    return y * p["gamma"][None, :, None] + p["beta"][None, :, None]


def tfar_reference(tensor_m, tensor_n, params):
    Tm = tensor_m.shape[2]
    Tn = tensor_n.shape[2]
    src_idx = (jnp.arange(Tm) * Tn) // Tm
    y1 = jax.nn.sigmoid(_ref_branch(tensor_n, params["w1"]))[:, :, src_idx]
    y2 = _ref_branch(tensor_m, params["w2"])
    y3 = _ref_branch(tensor_n, params["w3"])[:, :, src_idx]
    return y1 * y2 + y3


# ------------------------------- test --------------------------------------
def _make_branch(k, C):
    ks = jax.random.split(k, 6)
    return dict(
        weight=jax.random.normal(ks[0], (C, 3), jnp.float32) * 0.5,   # Conv1d (C,1,3) -> (C,3)
        bias=jax.random.normal(ks[1], (C,), jnp.float32) * 0.1,
        gamma=1.0 + 0.1 * jax.random.normal(ks[2], (C,), jnp.float32),
        beta=0.1 * jax.random.normal(ks[3], (C,), jnp.float32),
        mean=0.1 * jax.random.normal(ks[4], (C,), jnp.float32),
        var=0.5 + 0.5 * jnp.abs(jax.random.normal(ks[5], (C,), jnp.float32)),
    )


def _run_case(key, B, C, Tm, Tn):
    k_m, k_n, k1, k2, k3 = jax.random.split(key, 5)
    tensor_m = jax.random.normal(k_m, (B, C, Tm), jnp.float32)
    tensor_n = jax.random.normal(k_n, (B, C, Tn), jnp.float32)
    params = {"w1": _make_branch(k1, C), "w2": _make_branch(k2, C), "w3": _make_branch(k3, C)}

    out = jax.block_until_ready(tfar_forward(tensor_m, tensor_n, params))
    ref = jax.block_until_ready(tfar_reference(tensor_m, tensor_n, params))
    assert out.shape == (B, C, Tm), out.shape
    np.testing.assert_allclose(np.asarray(out), np.asarray(ref), rtol=1e-2, atol=1e-2)


if __name__ == "__main__":
    key = jax.random.PRNGKey(0)
    k0, k1, k2 = jax.random.split(key, 3)
    # padded time axis on both inputs (original toy shapes)
    _run_case(k0, B=2, C=16, Tm=16, Tn=8)
    # lane-aligned Tm (no output pad/slice, boundary-mask path on m), padded Tn
    _run_case(k1, B=2, C=8, Tm=128, Tn=8)
    # lane-aligned on both inputs (boundary-mask path on n and m, identity upsample)
    _run_case(k2, B=2, C=8, Tm=128, Tn=128)
    print("KERNEL_OK")
</pallas_src>

<mosaic_0001>
module attributes {stable_mosaic.version = 11 : i64} {
  func.func @kernel(%arg0: i32, %arg1: memref<16x128xf32, #tpu.memory_space<vmem>>, %arg2: memref<16x128xf32, #tpu.memory_space<vmem>>, %arg3: memref<128x128xf32, #tpu.memory_space<vmem>>, %arg4: memref<16x12xf32, #tpu.memory_space<vmem>>, %arg5: memref<16x128xf32, #tpu.memory_space<vmem>>) attributes {dimension_semantics = [#tpu.dimension_semantics<parallel>], iteration_bounds = array<i64: 2>, scalar_prefetch = 0 : i64, scratch_operands = 0 : i64, tpu.core_type = #tpu.core_type<tc>, window_params = [{transform_indices = @transform_0, window_bounds = array<i64: 16, 128>}, {transform_indices = @transform_1, window_bounds = array<i64: 16, 128>}, {pipeline_mode = #tpu.pipeline_mode<synchronous>, transform_indices = @transform_2, window_bounds = array<i64: 128, 128>}, {pipeline_mode = #tpu.pipeline_mode<synchronous>, transform_indices = @transform_3, window_bounds = array<i64: 16, 12>}, {transform_indices = @transform_4, window_bounds = array<i64: 16, 128>}]} {
    %c0 = arith.constant 0 : index
    %c0_0 = arith.constant 0 : index
    %0 = vector.load %arg1[%c0, %c0_0] : memref<16x128xf32, #tpu.memory_space<vmem>>, vector<16x128xf32>
    %c0_1 = arith.constant 0 : index
    %c0_2 = arith.constant 0 : index
    %1 = vector.load %arg2[%c0_1, %c0_2] : memref<16x128xf32, #tpu.memory_space<vmem>>, vector<16x128xf32>
    %c0_3 = arith.constant 0 : index
    %c0_4 = arith.constant 0 : index
    %2 = vector.load %arg3[%c0_3, %c0_4] : memref<128x128xf32, #tpu.memory_space<vmem>>, vector<128x128xf32>
    %c0_5 = arith.constant 0 : index
    %c0_6 = arith.constant 0 : index
    %3 = vector.load %arg4[%c0_5, %c0_6] : memref<16x12xf32, #tpu.memory_space<vmem>>, vector<16x12xf32>
    %c1_i32 = arith.constant 1 : i32
    %4 = tpu.dynamic_rotate %0 by %c1_i32 dim 1 : vector<16x128xf32>, i32 -> vector<16x128xf32>
    %c127_i32 = arith.constant 127 : i32
    %5 = tpu.dynamic_rotate %0 by %c127_i32 dim 1 : vector<16x128xf32>, i32 -> vector<16x128xf32>
    %c1_i32_7 = arith.constant 1 : i32
    %6 = tpu.dynamic_rotate %1 by %c1_i32_7 dim 1 : vector<16x128xf32>, i32 -> vector<16x128xf32>
    %c127_i32_8 = arith.constant 127 : i32
    %7 = tpu.dynamic_rotate %1 by %c127_i32_8 dim 1 : vector<16x128xf32>, i32 -> vector<16x128xf32>
    %8 = vector.extract_strided_slice %3 {offsets = [0, 0], sizes = [16, 1], strides = [1, 1]} : vector<16x12xf32> to vector<16x1xf32>
    %9 = vector.extract_strided_slice %3 {offsets = [0, 1], sizes = [16, 1], strides = [1, 1]} : vector<16x12xf32> to vector<16x1xf32>
    %10 = vector.extract_strided_slice %3 {offsets = [0, 2], sizes = [16, 1], strides = [1, 1]} : vector<16x12xf32> to vector<16x1xf32>
    %11 = vector.extract_strided_slice %3 {offsets = [0, 3], sizes = [16, 1], strides = [1, 1]} : vector<16x12xf32> to vector<16x1xf32>
    %12 = vector.broadcast %8 : vector<16x1xf32> to vector<16x128xf32>
    %13 = arith.mulf %12, %4 : vector<16x128xf32>
    %14 = vector.broadcast %9 : vector<16x1xf32> to vector<16x128xf32>
    %15 = arith.mulf %14, %0 : vector<16x128xf32>
    %16 = arith.addf %13, %15 : vector<16x128xf32>
    %17 = vector.broadcast %10 : vector<16x1xf32> to vector<16x128xf32>
    %18 = arith.mulf %17, %5 : vector<16x128xf32>
    %19 = arith.addf %16, %18 : vector<16x128xf32>
    %20 = vector.broadcast %11 : vector<16x1xf32> to vector<16x128xf32>
    %21 = arith.addf %19, %20 : vector<16x128xf32>
    %cst = arith.constant 5.000000e-01 : f32
    %22 = vector.broadcast %cst : f32 to vector<16x128xf32>
    %23 = arith.mulf %22, %21 : vector<16x128xf32>
    %24 = math.tanh %23 : vector<16x128xf32>
    %cst_9 = arith.constant 5.000000e-01 : f32
    %25 = vector.broadcast %cst_9 : f32 to vector<16x128xf32>
    %26 = arith.mulf %25, %24 : vector<16x128xf32>
    %cst_10 = arith.constant 5.000000e-01 : f32
    %27 = vector.broadcast %cst_10 : f32 to vector<16x128xf32>
    %28 = arith.addf %26, %27 : vector<16x128xf32>
    %29 = vector.extract_strided_slice %3 {offsets = [0, 4], sizes = [16, 1], strides = [1, 1]} : vector<16x12xf32> to vector<16x1xf32>
    %30 = vector.extract_strided_slice %3 {offsets = [0, 5], sizes = [16, 1], strides = [1, 1]} : vector<16x12xf32> to vector<16x1xf32>
    %31 = vector.extract_strided_slice %3 {offsets = [0, 6], sizes = [16, 1], strides = [1, 1]} : vector<16x12xf32> to vector<16x1xf32>
    %32 = vector.extract_strided_slice %3 {offsets = [0, 7], sizes = [16, 1], strides = [1, 1]} : vector<16x12xf32> to vector<16x1xf32>
    %33 = vector.broadcast %29 : vector<16x1xf32> to vector<16x128xf32>
    %34 = arith.mulf %33, %6 : vector<16x128xf32>
    %35 = vector.broadcast %30 : vector<16x1xf32> to vector<16x128xf32>
    %36 = arith.mulf %35, %1 : vector<16x128xf32>
    %37 = arith.addf %34, %36 : vector<16x128xf32>
    %38 = vector.broadcast %31 : vector<16x1xf32> to vector<16x128xf32>
    %39 = arith.mulf %38, %7 : vector<16x128xf32>
    %40 = arith.addf %37, %39 : vector<16x128xf32>
    %41 = vector.broadcast %32 : vector<16x1xf32> to vector<16x128xf32>
    %42 = arith.addf %40, %41 : vector<16x128xf32>
    %43 = vector.extract_strided_slice %3 {offsets = [0, 8], sizes = [16, 1], strides = [1, 1]} : vector<16x12xf32> to vector<16x1xf32>
    %44 = vector.extract_strided_slice %3 {offsets = [0, 9], sizes = [16, 1], strides = [1, 1]} : vector<16x12xf32> to vector<16x1xf32>
    %45 = vector.extract_strided_slice %3 {offsets = [0, 10], sizes = [16, 1], strides = [1, 1]} : vector<16x12xf32> to vector<16x1xf32>
    %46 = vector.extract_strided_slice %3 {offsets = [0, 11], sizes = [16, 1], strides = [1, 1]} : vector<16x12xf32> to vector<16x1xf32>
    %47 = vector.broadcast %43 : vector<16x1xf32> to vector<16x128xf32>
    %48 = arith.mulf %47, %4 : vector<16x128xf32>
    %49 = vector.broadcast %44 : vector<16x1xf32> to vector<16x128xf32>
    %50 = arith.mulf %49, %0 : vector<16x128xf32>
    %51 = arith.addf %48, %50 : vector<16x128xf32>
    %52 = vector.broadcast %45 : vector<16x1xf32> to vector<16x128xf32>
    %53 = arith.mulf %52, %5 : vector<16x128xf32>
    %54 = arith.addf %51, %53 : vector<16x128xf32>
    %55 = vector.broadcast %46 : vector<16x1xf32> to vector<16x128xf32>
    %56 = arith.addf %54, %55 : vector<16x128xf32>
    %57 = tpu.concatenate %28, %56 in 0 : vector<16x128xf32>, vector<16x128xf32> -> vector<32x128xf32>
    %cst_11 = arith.constant dense<0.000000e+00> : vector<32x128xf32>
    %58 = tpu.matmul %57, %2, %cst_11 {dimension_numbers = #tpu.dot_dimension_numbers<[1], [0], [0], [1], [0, 0, 1, 1], [], []>} : vector<32x128xf32>, vector<128x128xf32>, vector<32x128xf32> -> vector<32x128xf32>
    %59 = vector.extract_strided_slice %58 {offsets = [0, 0], sizes = [16, 128], strides = [1, 1]} : vector<32x128xf32> to vector<16x128xf32>
    %60 = vector.extract_strided_slice %58 {offsets = [16, 0], sizes = [16, 128], strides = [1, 1]} : vector<32x128xf32> to vector<16x128xf32>
    %61 = arith.mulf %59, %42 : vector<16x128xf32>
    %62 = arith.addf %61, %60 : vector<16x128xf32>
    %c0_12 = arith.constant 0 : index
    %c0_13 = arith.constant 0 : index
    %63 = vector.load %arg5[%c0_12, %c0_13] : memref<16x128xf32, #tpu.memory_space<vmem>>, vector<16x128xf32>
    tpu.vector_store %arg5[%c0_12, %c0_13], %62 {strides = array<i32>} : memref<16x128xf32, #tpu.memory_space<vmem>>, vector<16x128xf32>,
    return
  }
  func.func @transform_0(%arg0: i32) -> (i32, i32) {
    %c0_i32 = arith.constant 0 : i32
    %c0_i32_0 = arith.constant 0 : i32
    return %arg0, %c0_i32 : i32, i32
  }
  func.func @transform_1(%arg0: i32) -> (i32, i32) {
    %c0_i32 = arith.constant 0 : i32
    %c0_i32_0 = arith.constant 0 : i32
    return %arg0, %c0_i32 : i32, i32
  }
  func.func @transform_2(%arg0: i32) -> (i32, i32) {
    %c0_i32 = arith.constant 0 : i32
    %c0_i32_0 = arith.constant 0 : i32
    %c0_i32_1 = arith.constant 0 : i32
    return %c0_i32, %c0_i32_0 : i32, i32
  }
  func.func @transform_3(%arg0: i32) -> (i32, i32) {
    %c0_i32 = arith.constant 0 : i32
    %c0_i32_0 = arith.constant 0 : i32
    %c0_i32_1 = arith.constant 0 : i32
    return %c0_i32, %c0_i32_0 : i32, i32
  }
  func.func @transform_4(%arg0: i32) -> (i32, i32) {
    %c0_i32 = arith.constant 0 : i32
    %c0_i32_0 = arith.constant 0 : i32
    return %arg0, %c0_i32 : i32, i32
  }
}

</mosaic_0001>

<bundles_post_ra>
// kernel: tpu_custom_call.1
= control target key start
LH: loop header
LB: loop body
LE: loop exit
PB: predicated region body
PF: predicated region fallthrough
CT: control target
= control target key end

     0   :  { %s1345_s0 = inlined_call_operand.hbm [shape: f32[32,128], index: 0, kind: input, shape index: {}]   ;;  %s1346_s1 = inlined_call_operand.hbm [shape: f32[32,128], index: 1, kind: input, shape index: {}]   ;;  %s1347_s2 = inlined_call_operand.hbm [shape: f32[128,128], index: 2, kind: input, shape index: {}]   ;;  %s1348_s3 = inlined_call_operand.hbm [shape: f32[16,12], index: 3, kind: input, shape index: {}]   ;;  %s1349_s4 = inlined_call_operand.hbm [shape: f32[32,128], index: 4, kind: output, shape index: {}]  }
   0x1   :  { %1354 = sst [smem:[#allocation16_spill]] %s1345_s0 }
   0x2   :  { %1355 = sst [smem:[#allocation17_spill]] %s1347_s2 }
   0x3   :  { %1356 = sst [smem:[#allocation18_spill]] %s1348_s3 }
   0x4   :  { %9 = vsyncpa [#allocation3], 0 }
   0x5   :  { %11 = vsyncpa [#allocation3 + $0x1], 0 }
   0x6   :  { %12 = vsyncpa [#allocation6], 0 }
   0x7   :  { %14 = vsyncpa [#allocation6 + $0x1], 0 }
   0x8   :  { %15 = vsyncpa [#allocation9], 0 }
   0x9   :  { %16 = vsyncpa [#allocation4], 0 }
   0xa   :  { %18 = vsyncpa [#allocation4 + $0x1], 0  ;;  %s1077_s15 = smov 0   ;;  %s1079_s16 = smov 0  }
   0xb   :  { %s1081_s17 = smov 0   ;;  %s1083_s18 = smov 0  }
   0xc LB: > { %s1098_s19 = sadd.s32 4294967295, %s1030_s18   ;;  %s642_s20 = sadd.s32 4294967294, %s1030_s18   ;;  %s1030_s18 = sphi %s1083_s18, %s1371_s18   ;;  %s1026_s17 = sphi %s1081_s17, %s1370_s17   ;;  %s1022_s16 = sphi %s1079_s16, %s1369_s16   ;;  %s1018_s15 = sphi %s1077_s15, %s1368_s15  }
   0xd   : > { %p44_p0 = scmp.ne.s32.totalorder %s1022_s16, %s1018_s15  ;;  %p45_p1 = scmp.eq.s32.totalorder %s1098_s19, 0 }
   0xe   : > { %p136_p2 = scmp.eq.s32.totalorder %s1098_s19, 1  ;;  %p142_p3 = scmp.eq.s32.totalorder %s642_s20, 1 }
   0xf   : > { %p1107_p4 = por %p45_p1, %p44_p0  ;;  %p643_p5 = scmp.ge.s32.totalorder %s1030_s18, 1 }
  0x10   : > { %p1112_p6 = por %p142_p3, %p44_p0  ;;  %p149_p7 = scmp.lt.s32.totalorder %s1030_s18, 3 }
  0x11   : > { %s1359_s2 = sld [smem:[#allocation17_spill]]  ;;  %s1032_s27 = smov [#allocation7]  }
  0x12   : > { %p1120_p8 = pnand %p643_p5, %p149_p7  ;;  %s162_s28 = sshll.u32 %s1032_s27, 4  ;;  %s163_s28 = int_to_ptr.vmem [resolvable:$true] %s162_s28 }
  0x13   : > { %s1361_s3 = sld [smem:[#allocation18_spill]]  ;;  %s1350_s6 = smov 128  }
  0x14   : > { %p729_p9 = pneg %p1120_p8  ;;  %s1352_s7 = smov 8  }
  0x15   : > { %s1035_s8 = smov [#allocation8]   ;;  %s1139_s10 = sadd.s32 1, %s1030_s18  }
  0x16   : > { %p730_p10 = pnand %p729_p9, %p45_p1  ;;  %s176_s9 = sshll.u32 %s1035_s8, 4  ;;  %s177_s9 = int_to_ptr.vmem [resolvable:$true] %s176_s9 }
  0x17   : > { %s160_s25 = sshll.u32 %s1359_s2, 4  ;;  %s31_s11 = sadd.s32 1, %s1026_s17  ;;  %s161_s25 = int_to_ptr.hbm [resolvable:$true] %s160_s25 }
  0x18   : > { %732 = dma.hbm_to_vmem [thread:$0]  (!%p730_p10), %s161_s25, 2048, %s163_s28, [#allocation6], %s1350_s6, %s1350_s6, %s1352_s7  }
  0x19   : > { %s174_s5 = sshll.u32 %s1361_s3, 4  ;;  %s28_s12 = ssub.s32 %s1030_s18, %s1139_s10  ;;  %s175_s5 = int_to_ptr.hbm [resolvable:$true] %s174_s5 }
  0x1a   : > { %735 = dma.hbm_to_vmem [thread:$0]  (!%p730_p10), %s175_s5, 256, %s177_s9, [#allocation9], %s1350_s6, %s1350_s6, %s1352_s7  }
  0x1b   : > { %p38_p12 = scmp.ne.s32.totalorder %s1026_s17, %s1022_s16  ;;  %p29_p13 = scmp.eq.s32.totalorder %s28_s12, 0 }
  0x1c   : > { %p39_p0 = scmp.eq.s32.totalorder %s1030_s18, 0  ;;  %p749_p5 = scmp.lt.s32.totalorder %s1030_s18, 2 }
  0x1d   : > { %p1149_p3 = por %p136_p2, %p38_p12  ;;  %s190_s20 = sand.u32 1, %s1026_s17  }
  0x1e   : > { %s1155_s14 = scalar_select %p29_p13, %s1026_s17, %s31_s11  }
  0x1f   : > { %p40_p7 = por %p39_p0, %p38_p12  ;;  %s1158_s23 = sshll.u32 %s190_s20, 4 }
  0x20   : > { %s664_s24 = sshll.u32 %s1030_s18, 4  ;;  %s1363_s0 = sld [smem:[#allocation16_spill]] }
  0x21   : > { %s194_s29 = scalar_lea.vmem [#allocation2], %s1158_s23  ;;  %p1165_p2 = pnand %p749_p5, %p40_p7 }
  0x22   : > { %s202_s30 = sshll.u32 %s194_s29, 4  ;;  %s221_s12 = scalar_lea.hbm %s1346_s1, %s664_s24  ;;  %s203_s30 = int_to_ptr.vmem [resolvable:$true] %s202_s30 }
  0x23   : > { %s222_s6 = sshll.u32 %s221_s12, 4  ;;  %s191_s7 = scalar_lea.sflag [#allocation3], %s190_s20  ;;  %s223_s6 = int_to_ptr.hbm [resolvable:$true] %s222_s6 }
  0x24   : > { %p896_p10 = pneg %p1165_p2 }
  0x26   : > { %s199_s28 = scalar_lea.hbm %s1363_s0, %s664_s24  ;;  %s899_s29 = scalar_lea.hbm %s1363_s0, 32 }
  0x27   : > { %s200_s5 = sshll.u32 %s199_s28, 4  ;;  %s201_s5 = int_to_ptr.hbm [resolvable:$true] %s200_s5 }
  0x28   : > { %s892_s2 = sshra.s32 %s201_s5, 4  ;;  %s893_s2 = int_to_ptr.hbm [resolvable:$true] %s892_s2 }
  0x29   : > { %s894_s25 = scalar_lea.hbm %s893_s2, 16  ;;  %p900_p0 = scmp.lt.s32.totalorder %s893_s2, %s1363_s0 }
  0x2a   : > { %p895_p9 = scmp.ne.s32.totalorder %s893_s2, %s894_s25  ;;  %p901_p5 = scmp.lt.s32.totalorder %s899_s29, %s894_s25 }
  0x2c   : > { %p897_p12 = pnand %p896_p10, %p895_p9  ;;  %p902_p7 = por %p901_p5, %p900_p0 }
  0x2e   : > { %p898_p13 = pneg %p897_p12 }
  0x30   : > { %p903_p11 = pnand %p902_p7, %p898_p13 }
  0x32   : > { %906 = shalt.err (!%p903_p11)
}
  0x33   : > { %s1365_s20 = smov 8   ;;  %s1366_s24 = smov 128  }
  0x34   : > { %739 = dma.hbm_to_vmem [thread:$0]  (!%p1165_p2), %s201_s5, 256, %s203_s30, %s191_s7, %s1366_s24, %s1366_s24, %s1365_s20  }
  0x35   : > { %s216_s12 = scalar_lea.vmem [#allocation5], %s1158_s23  ;;  %s212_s28 = sand.u32 1, %s1030_s18  }
  0x36   : > { %s224_s27 = sshll.u32 %s216_s12, 4  ;;  %s213_s9 = scalar_lea.sflag [#allocation6], %s212_s28  ;;  %s225_s27 = int_to_ptr.vmem [resolvable:$true] %s224_s27 }
  0x37   : > { %s922_s2 = sshra.s32 %s223_s6, 4  ;;  %s929_s0 = scalar_lea.hbm %s1346_s1, 32  ;;  %s923_s2 = int_to_ptr.hbm [resolvable:$true] %s922_s2 }
  0x38   : > { %s924_s25 = scalar_lea.hbm %s923_s2, 16  ;;  %p930_p13 = scmp.lt.s32.totalorder %s923_s2, %s1346_s1 }
  0x39   : > { %p925_p9 = scmp.ne.s32.totalorder %s923_s2, %s924_s25  ;;  %p931_p0 = scmp.lt.s32.totalorder %s929_s0, %s924_s25 }
  0x3b   : > { %p927_p11 = pnand %p925_p9, %p896_p10  ;;  %p932_p5 = por %p931_p0, %p930_p13 }
  0x3d   : > { %p928_p12 = pneg %p927_p11 }
  0x3f   : > { %p933_p7 = pnand %p932_p5, %p928_p12 }
  0x41   : > { %936 = shalt.err (!%p933_p7)
}
  0x42   : > { %742 = dma.hbm_to_vmem [thread:$0]  (!%p1165_p2), %s223_s6, 256, %s225_s27, %s213_s9, %s1366_s24, %s1366_s24, %s1365_s20  }
  0x43   : > { %236 = sbr.rel (%p1120_p8) target bundleno = 392 (0x188), region = 36  ;;  %s1207_s23 = sand.u32 (!%p1120_p8), 1, %s1022_s16  }
  0x44   : > { %s1210_s3 = sshll.u32 (!%p1120_p8), %s1207_s23, 4  ;;  %s239_s0 = scalar_lea.sflag (!%p1120_p8), [#allocation3], %s1207_s23 }
  0x45   : > { %s242_s30 = scalar_lea.vmem (!%p1120_p8), [#allocation2], %s1210_s3 }
  0x48   : > { %997 = dma.done.wait (%p1107_p4), %s239_s0, 256  }
  0x49   : > { %999 = vsyncadd (%p1107_p4), %s239_s0, 4294967040  ;;  %s248_s26 = sand.u32 1, %s1098_s19   ;;  %s252_s5 = scalar_lea.vmem [#allocation5], %s1210_s3 }
  0x4a   : > { %s249_s6 = scalar_lea.sflag [#allocation6], %s248_s26 }
  0x4b   : > { %1001 = dma.done.wait (%p1107_p4), %s249_s6, 256  }
  0x4c   : > { %1003 = vsyncadd (%p1107_p4), %s249_s6, 4294967040 }
  0x4d   : > { %1005 = dma.done.wait (%p45_p1), [#allocation6], 2048  }
  0x4e   : > { %1007 = vsyncadd (%p45_p1), [#allocation6], 4294965248 }
  0x4f   : > { %1009 = dma.done.wait (%p45_p1), [#allocation9], 256  }
  0x50   : > { %1011 = vsyncadd (%p45_p1), [#allocation9], 4294967040  ;;  %v1036_v0 = vmov 0   ;;  %v1037_v1 = vmov 1   ;;  %v1038_v2 = vmov 2   ;;  %v1232_v3 = vld [vmem:[#allocation8] sm:$0xff] }
  0x51   : > { %805 = vset.pattern.permute.xlu1 %v1036_v0  ;;  %806 = vset.pattern.permute.xlu2 %v1037_v1  ;;  %v1234_v4 = vld [vmem:[%s242_s30] sm:$0xff]  ;;  %s1039_s21 = smov 1   ;;  %v1240_v5 = vld [vmem:[#allocation8 + $0x8] sm:$0xff]  ;;  %s1040_s8 = smov 127   ;;  %v1041_v7 = vmov 3   ;;  %v1042_v8 = vmov 8  }
  0x52   : > { %808 = vset.pattern.permute.xlu0 %v1038_v2  ;;  %336 = vperm.xlu1 %805, %v1232_v3   ;;  %v1242_v6 = vld [vmem:[%s242_s30 + $0x8] sm:$0xff]  ;;  %v1043_v9 = vmov 9   ;;  %v1044_v10 = vmov 11   ;;  %v1045_v11 = vmov 10   ;;  %v314_v13 = vld [vmem:[#allocation7 + $0x70] sm:$0xff]  ;;  %v312_v17 = vld [vmem:[#allocation7 + $0x60] sm:$0xff] }
  0x53   : > { %318 = vrot.lane.b32.xlu0 %v1234_v4, %s1039_s21  ;;  %347 = vperm.xlu2 %806, %v1232_v3   ;;  %v315_v12 = vld [vmem:[#allocation7 + $0x78] sm:$0xff]  ;;  %v313_v15 = vld [vmem:[#allocation7 + $0x68] sm:$0xff]  ;;  %v1270_v16 = vld [vmem:[%s252_s5] sm:$0xff]  ;;  %v1046_v25 = vmov 5   ;;  %v1047_v26 = vmov 4   ;;  %v1048_v36 = vmov 6  }
  0x54   : > { %476 = vmatpush.msra.mxu0 %v315_v12  ;;  %668 = vmatpush.msra.mxu2 %v315_v12  ;;  %v311_v18 = vld [vmem:[#allocation7 + $0x58] sm:$0xff]  ;;  %v310_v19 = vld [vmem:[#allocation7 + $0x50] sm:$0xff]  ;;  %v309_v20 = vld [vmem:[#allocation7 + $0x48] sm:$0xff]  ;;  %v1049_v41 = vmov 7   ;;  %s292_s20 = scalar_lea.vmem [#allocation10], %s1210_s3  ;;  %s666_s24 = sshll.u32 %s1098_s19, 4 }
  0x55   : > { %667 = vmatpush.msra.mxu1 %v315_v12  ;;  %669 = vmatpush.msra.mxu3 %v315_v12  ;;  %v308_v21 = vld [vmem:[#allocation7 + $0x40] sm:$0xff]  ;;  %v307_v23 = vld [vmem:[#allocation7 + $0x38] sm:$0xff]  ;;  %v306_v24 = vld [vmem:[#allocation7 + $0x30] sm:$0xff]  ;;  %s523_s28 = scalar_lea.hbm %s1349_s4, %s666_s24  ;;  %s524_s9 = sshll.u32 %s292_s20, 4  ;;  %s525_s9 = int_to_ptr.vmem [resolvable:$true] %s524_s9 }
  0x56   : > { %477 = vmatpush.msra.mxu0 %v314_v13  ;;  %671 = vmatpush.msra.mxu2 %v314_v13  ;;  %v305_v27 = vld [vmem:[#allocation7 + $0x28] sm:$0xff]  ;;  %v304_v28 = vld [vmem:[#allocation7 + $0x20] sm:$0xff]  ;;  %v303_v30 = vld [vmem:[#allocation7 + $0x18] sm:$0xff]  ;;  %s526_s2 = sshll.u32 %s523_s28, 4  ;;  %s512_s25 = scalar_lea.sflag [#allocation4], %s1207_s23  ;;  %s527_s2 = int_to_ptr.hbm [resolvable:$true] %s526_s2 }
  0x57   : > { %670 = vmatpush.msra.mxu1 %v314_v13  ;;  %672 = vmatpush.msra.mxu3 %v314_v13  ;;  %v1281_v29 = vld [vmem:[%s252_s5 + $0x8] sm:$0xff]  ;;  %v302_v34 = vld [vmem:[#allocation7 + $0x10] sm:$0xff]  ;;  %v300_v37 = vld [vmem:[#allocation7] sm:$0xff]  ;;  %s966_s29 = sshra.s32 %s527_s2, 4  ;;  %s972_s3 = scalar_lea.hbm %s1349_s4, 32  ;;  %s967_s29 = int_to_ptr.hbm [resolvable:$true] %s966_s29 }
  0x58   : > { %478 = vmatpush.msra.mxu0 %v313_v15  ;;  %674 = vmatpush.msra.mxu2 %v313_v15  ;;  %v301_v35 = vld [vmem:[#allocation7 + $0x8] sm:$0xff]  ;;  %s968_s19 = scalar_lea.hbm %s967_s29, 16  ;;  %p973_p2 = scmp.lt.s32.totalorder %s967_s29, %s1349_s4 }
  0x59   : > { %673 = vmatpush.msra.mxu1 %v313_v15  ;;  %675 = vmatpush.msra.mxu3 %v313_v15  ;;  %p969_p1 = scmp.ne.s32.totalorder %s967_s29, %s968_s19  ;;  %p974_p10 = scmp.lt.s32.totalorder %s972_s3, %s968_s19 }
  0x5a   : > { %341 = vperm.xlu1 %805, %v1240_v5   ;;  %479 = vmatpush.msra.mxu0 %v312_v17 }
  0x5b   : > { %320 = vrot.lane.b32.xlu0 %v1242_v6, %s1039_s21  ;;  %351 = vperm.xlu2 %806, %v1240_v5   ;;  %p970_p4 = pnand %p969_p1, %p1149_p3  ;;  %p975_p9 = por %p974_p10, %p973_p2 }
  0x5c   : > { %677 = vmatpush.msra.mxu2 %v312_v17  ;;  %676 = vmatpush.msra.mxu1 %v312_v17 }
  0x5d   : > { %480 = vmatpush.msra.mxu0 %v311_v18  ;;  %678 = vmatpush.msra.mxu3 %v312_v17  ;;  %p971_p8 = pneg %p970_p4 }
  0x5e   : > { %680 = vmatpush.msra.mxu2 %v311_v18  ;;  %679 = vmatpush.msra.mxu1 %v311_v18 }
  0x5f   : > { %481 = vmatpush.msra.mxu0 %v310_v19  ;;  %681 = vmatpush.msra.mxu3 %v311_v18  ;;  %p976_p11 = pnand %p975_p9, %p971_p8 }
  0x60   : > { %683 = vmatpush.msra.mxu2 %v310_v19  ;;  %682 = vmatpush.msra.mxu1 %v310_v19 }
  0x61   : > { %482 = vmatpush.msra.mxu0 %v309_v20  ;;  %684 = vmatpush.msra.mxu3 %v310_v19 }
  0x62   : > { %324 = vrot.lane.b32.xlu1 %v1242_v6, %s1040_s8  ;;  %686 = vmatpush.msra.mxu2 %v309_v20 }
  0x63   : > { %322 = vrot.lane.b32.xlu0 %v1234_v4, %s1040_s8  ;;  %809 = vset.pattern.permute.xlu1 %v1041_v7 }
  0x64   : > { %807 = vset.pattern.permute.xlu2 %v1038_v2  ;;  %685 = vmatpush.msra.mxu1 %v309_v20 }
  0x65   : > { %359 = vperm.xlu2 %807, %v1232_v3   ;;  %483 = vmatpush.msra.mxu0 %v308_v21 }
  0x66   : > { %689 = vmatpush.msra.mxu2 %v308_v21  ;;  %688 = vmatpush.msra.mxu1 %v308_v21 }
  0x67   : > { %484 = vmatpush.msra.mxu0 %v307_v23  ;;  %687 = vmatpush.msra.mxu3 %v309_v20 }
  0x68   : > { %692 = vmatpush.msra.mxu2 %v307_v23  ;;  %691 = vmatpush.msra.mxu1 %v307_v23 }
  0x69   : > { %485 = vmatpush.msra.mxu0 %v306_v24  ;;  %690 = vmatpush.msra.mxu3 %v308_v21 }
  0x6a   : > { %371 = vperm.xlu1 %809, %v1232_v3   ;;  %695 = vmatpush.msra.mxu2 %v306_v24 }
  0x6b   : > { %363 = vperm.xlu0 %808, %v1240_v5   ;;  %486 = vmatpush.msra.mxu0 %v305_v27 }
  0x6c   : > { %694 = vmatpush.msra.mxu1 %v306_v24  ;;  %698 = vmatpush.msra.mxu2 %v305_v27 }
  0x6d   : > { %810 = vset.pattern.permute.xlu2 %v1041_v7  ;;  %487 = vmatpush.msra.mxu0 %v304_v28 }
  0x6e   : > { %375 = vperm.xlu2 %810, %v1240_v5   ;;  %697 = vmatpush.msra.mxu1 %v305_v27 }
  0x6f   : > { %701 = vmatpush.msra.mxu2 %v304_v28  ;;  %488 = vmatpush.msra.mxu0 %v303_v30 }
  0x70   : > { %700 = vmatpush.msra.mxu1 %v304_v28  ;;  %693 = vmatpush.msra.mxu3 %v307_v23 }
  0x71   : > { %704 = vmatpush.msra.mxu2 %v303_v30  ;;  %489 = vmatpush.msra.mxu0 %v302_v34 }
  0x72   : > { %811 = vset.pattern.permute.xlu1 %v1042_v8  ;;  %703 = vmatpush.msra.mxu1 %v303_v30 }
  0x73   : > { %813 = vset.pattern.permute.xlu0 %v1043_v9  ;;  %433 = vperm.xlu1 %811, %v1232_v3  }
  0x74   : > { %443 = vperm.xlu0 %813, %v1232_v3   ;;  %707 = vmatpush.msra.mxu2 %v302_v34 }
  0x75   : > { %490 = vmatpush.msra.mxu0 %v301_v35  ;;  %706 = vmatpush.msra.mxu1 %v302_v34 }
  0x76   : > { %812 = vset.pattern.permute.xlu2 %v1042_v8  ;;  %710 = vmatpush.msra.mxu2 %v301_v35 }
  0x77   : > { %437 = vperm.xlu2 %812, %v1240_v5   ;;  %491 = vmatpush.msra.mxu0 %v300_v37 }
  0x78   : > { %709 = vmatpush.msra.mxu1 %v301_v35  ;;  %713 = vmatpush.msra.mxu2 %v300_v37 }
  0x79   : > { %696 = vmatpush.msra.mxu3 %v306_v24 }
  0x7a   : > { %712 = vmatpush.msra.mxu1 %v300_v37 }
  0x7b   : > { %814 = vset.pattern.permute.xlu1 %v1043_v9  ;;  %699 = vmatpush.msra.mxu3 %v305_v27 }
  0x7c   : > { %818 = vset.pattern.permute.xlu0 %v1044_v10  ;;  %447 = vperm.xlu1 %814, %v1240_v5  }
  0x7d   : > { %471 = vperm.xlu0 %818, %v1240_v5   ;;  %702 = vmatpush.msra.mxu3 %v304_v28 }
  0x7f   : > { %815 = vset.pattern.permute.xlu2 %v1045_v11  ;;  %705 = vmatpush.msra.mxu3 %v303_v30 }
  0x80   : > { %455 = vperm.xlu2 %815, %v1232_v3  }
  0x81   : > { %708 = vmatpush.msra.mxu3 %v302_v34 }
  0x83   : > { %711 = vmatpush.msra.mxu3 %v301_v35 }
  0x84   : > { %816 = vset.pattern.permute.xlu1 %v1045_v11 }
  0x85   : > { %459 = vperm.xlu1 %816, %v1240_v5   ;;  %820 = vset.pattern.permute.xlu0 %v1047_v26 }
  0x86   : > { %393 = vperm.xlu0 %820, %v1240_v5   ;;  %714 = vmatpush.msra.mxu3 %v300_v37 }
  0x88   : > { %817 = vset.pattern.permute.xlu2 %v1044_v10 }
  0x89   : > { %467 = vperm.xlu2 %817, %v1232_v3  }
  0x8d   : > { %326 = vrot.lane.b32.xlu1 %v1270_v16, %s1039_s21 }
  0x8e   : > { %821 = vset.pattern.permute.xlu1 %v1046_v25  ;;  %824 = vset.pattern.permute.xlu0 %v1048_v36 }
  0x8f   : > { %415 = vperm.xlu0 %824, %v1240_v5  }
  0x91   : > { %328 = vrot.lane.b32.xlu2 %v1281_v29, %s1039_s21 }
  0x92   : > { %819 = vset.pattern.permute.xlu2 %v1047_v26 }
  0x95   : > { %330 = vrot.lane.b32.xlu1 %v1270_v16, %s1040_s8 }
  0x97   : > { %827 = vset.pattern.permute.xlu0 %v1044_v10 }
  0x99   : > { %389 = vperm.xlu2 %819, %v1232_v3  }
  0x9d   : > { %399 = vperm.xlu1 %821, %v1232_v3  }
  0xa1   : > { %822 = vset.pattern.permute.xlu2 %v1046_v25 }
  0xa2   : > { %403 = vperm.xlu2 %822, %v1240_v5  }
  0xa5   : > { %332 = vrot.lane.b32.xlu1 %v1281_v29, %s1040_s8 }
  0xa6   : > { %825 = vset.pattern.permute.xlu1 %v1049_v41 }
  0xaa   : > { %823 = vset.pattern.permute.xlu2 %v1048_v36 }
  0xab   : > { %411 = vperm.xlu2 %823, %v1232_v3  }
  0xad   : > { %v1266_v14 = vpop.permute.xlu2 %347  ;;  %423 = vperm.xlu1 %825, %v1232_v3  }
  0xae   : > { %v354_v44 = vmul.f32 %v1266_v14, %v1234_v4 }
  0xb3   : > { %826 = vset.pattern.permute.xlu2 %v1049_v41 }
  0xb4   : > { %427 = vperm.xlu2 %826, %v1240_v5  }
  0xb5   : > { %v1276_v22 = vpop.permute.xlu2 %351 }
  0xb6   : > { %v355_v50 = vmul.f32 %v1276_v22, %v1242_v6 }
  0xbf   : > { %v360_v31 = vpop.permute.xlu2 %359 }
  0xc4   : > { %v337_v32 = vpop.permute.xlu1 %336 }
  0xc5   : > { %v1284_v33 = vpop.permute.xlu0 %318 }
  0xc6   : > { %v344_v45 = vmul.f32 %v337_v32, %v1284_v33 }
  0xc8   : > { %v376_v40 = vpop.permute.xlu2 %375  ;;  %v356_v48 = vadd.f32 %v354_v44, %v344_v45 }
  0xcc   : > { %v342_v38 = vpop.permute.xlu1 %341 }
  0xcd   : > { %v1291_v39 = vpop.permute.xlu0 %320 }
  0xce   : > { %v345_v49 = vmul.f32 %v342_v38, %v1291_v39 }
  0xd0   : > { %v357_v54 = vadd.f32 %v355_v50, %v345_v49 }
  0xd1   : > { %v438_v47 = vpop.permute.xlu2 %437 }
  0xd2   : > { %v441_v18 = vmul.f32 %v438_v47, %v1291_v39 }
  0xd4   : > { %v325_v42 = vpop.permute.xlu1 %324 }
  0xd5   : > { %v323_v43 = vpop.permute.xlu0 %322 }
  0xd6   : > { %v366_v46 = vmul.f32 %v360_v31, %v323_v43 }
  0xd8   : > { %v368_v51 = vadd.f32 %v366_v46, %v356_v48 }
  0xda   : > { %v456_v60 = vpop.permute.xlu2 %455 }
  0xdb   : > { %v462_v7 = vmul.f32 %v456_v60, %v323_v43 }
  0xdc   : > { %v372_v52 = vpop.permute.xlu1 %371 }
  0xdd   : > { %v364_v53 = vpop.permute.xlu0 %363  ;;  %v378_v55 = vadd.f32 %v372_v52, %v368_v51 }
  0xde   : > { %v367_v56 = vmul.f32 %v364_v53, %v325_v42 }
  0xdf   : > { %v380_v57 = vmul.f32 0.5, %v378_v55 }
  0xe0   : > { %v369_v58 = vadd.f32 %v367_v56, %v357_v54 }
  0xe1   : > { %828 = vtanh.f32 %v380_v57 }
  0xe2   : > { %v379_v59 = vadd.f32 %v376_v40, %v369_v58 }
  0xe3   : > { %v468_v10 = vpop.permute.xlu2 %467 }
  0xe4   : > { %v381_v61 = vmul.f32 0.5, %v379_v59 }
  0xe5   : > { %v434_v62 = vpop.permute.xlu1 %433 }
  0xe6   : > { %v444_v63 = vpop.permute.xlu0 %443  ;;  %830 = vtanh.f32 %v381_v61  ;;  %v440_v0 = vmul.f32 %v434_v62, %v1284_v33 }
  0xe7   : > { %v450_v1 = vmul.f32 %v444_v63, %v1234_v4  ;;  %v829_v2 = vpop.eup %828 }
  0xe8   : > { %v384_v9 = vmul.f32 0.5, %v829_v2 }
  0xe9   : > { %v452_v8 = vadd.f32 %v450_v1, %v440_v0 }
  0xea   : > { %v386_v11 = vadd.f32 0.5, %v384_v9 }
  0xeb   : > { %v464_v3 = vadd.f32 %v462_v7, %v452_v8  ;;  %v329_v25 = vpop.permute.xlu2 %328 }
  0xec   : > { %v831_v12 = vpop.eup %830  ;;  %492 = vmatmul.f32.vlgmr.msra.gmra.mxu0 %v386_v11 }
  0xed   : > { %v474_v13 = vadd.f32 %v468_v10, %v464_v3  ;;  %v385_v14 = vmul.f32 0.5, %v831_v12 }
  0xee   : > { %v448_v15 = vpop.permute.xlu1 %447 }
  0xef   : > { %498 = vmatmul.f32.vlgmr.msra.gmra.mxu2 %v474_v13  ;;  %v387_v17 = vadd.f32 0.5, %v385_v14  ;;  %v451_v4 = vmul.f32 %v448_v15, %v1242_v6  ;;  %v472_v22 = vpop.permute.xlu0 %471 }
  0xf1   : > { %495 = vmatmul.f32.vlgmr.msra.gmra.mxu1 %v387_v17  ;;  %v453_v20 = vadd.f32 %v451_v4, %v441_v18 }
  0xf3   : > { %v390_v27 = vpop.permute.xlu2 %389 }
  0xf7   : > { %v460_v19 = vpop.permute.xlu1 %459 }
  0xf8   : > { %v463_v21 = vmul.f32 %v460_v19, %v325_v42  ;;  %v394_v36 = vpop.permute.xlu0 %393 }
  0xf9   : > { %v397_v44 = vmul.f32 %v394_v36, %v329_v25 }
  0xfa   : > { %v465_v5 = vadd.f32 %v463_v21, %v453_v20 }
  0xfc   : > { %v475_v23 = vadd.f32 %v472_v22, %v465_v5  ;;  %v404_v30 = vpop.permute.xlu2 %403 }
  0xfd   : > { %v407_v43 = vmul.f32 %v404_v30, %v1281_v29 }
  0xfe   : > { %501 = vmatmul.f32.vlgmr.msra.gmra.mxu3 %v475_v23 }
  0xff   : > { %v327_v24 = vpop.permute.xlu1 %326  ;;  %v409_v47 = vadd.f32 %v407_v43, %v397_v44 }
 0x100   : > { %v396_v32 = vmul.f32 %v390_v27, %v327_v24 }
 0x101   : > { %v416_v46 = vpop.permute.xlu0 %415 }
 0x105   : > { %v412_v33 = vpop.permute.xlu2 %411 }
 0x107   : > { %v331_v26 = vpop.permute.xlu1 %330 }
 0x108   : > { %v418_v35 = vmul.f32 %v412_v33, %v331_v26 }
 0x10e   : > { %v428_v49 = vpop.permute.xlu2 %427 }
 0x10f   : > { %v400_v28 = vpop.permute.xlu1 %399 }
 0x110   : > { %v406_v6 = vmul.f32 %v400_v28, %v1270_v16 }
 0x112   : > { %v408_v34 = vadd.f32 %v406_v6, %v396_v32 }
 0x114   : > { %v420_v37 = vadd.f32 %v418_v35, %v408_v34 }
 0x117   : > { %v333_v31 = vpop.permute.xlu1 %332 }
 0x118   : > { %v419_v16 = vmul.f32 %v416_v46, %v333_v31 }
 0x11a   : > { %v421_v48 = vadd.f32 %v419_v16, %v409_v47 }
 0x11c   : > { %v431_v51 = vadd.f32 %v428_v49, %v421_v48 }
 0x11f   : > { %v424_v38 = vpop.permute.xlu1 %423 }
 0x120   : > { %v430_v40 = vadd.f32 %v424_v38, %v420_v37 }
 0x169   : > { %v493_v39 = vpop.f32.mrf.mxu0 }
 0x16a   : > { %v505_v41 = vmul.f32 %v493_v39, %v430_v40 }
 0x16e   : > { %v496_v50 = vpop.f32.mrf.mxu1 }
 0x16f   : > { %v506_v29 = vmul.f32 %v496_v50, %v431_v51 }
 0x172   : > { %v499_v42 = vpop.f32.mrf.mxu2 }
 0x173   : > { %v507_v45 = vadd.f32 %v505_v41, %v499_v42 }
 0x175   : > { %509 = vst [vmem:[%s292_s20] sm:$0xff] %v507_v45 }
 0x181   : > { %v502_v52 = vpop.f32.mrf.mxu3 }
 0x182   : > { %v508_v53 = vadd.f32 %v506_v29, %v502_v52 }
 0x184   : > { %510 = vst [vmem:[%s292_s20 + $0x8] sm:$0xff] %v508_v53 }
 0x185   : > { %979 = shalt.err (!%p976_p11)
}
 0x186   : > { %s1050_s23 = smov 128   ;;  %s1051_s26 = smov 8  }
 0x187   : > { %727 = dma.vmem_to_hbm [thread:$0]  (%p1149_p3), %s525_s9, 256, %s527_s2, %s512_s25, %s1050_s23, %s1050_s23, %s1051_s26  }
 0x188 PF: > { %s541_s6 = sand.u32 1, %s1018_s15   ;;  %p1367_p12 = scmp.ge.s32.totalorder %s1030_s18, 2 }
 0x189   : > { %s542_s5 = scalar_lea.sflag [#allocation4], %s541_s6 }
 0x18a   : > { %p744_p13 = pnand %p1367_p12, %p1112_p6 }
 0x18c   : > { %p745_p0 = pneg %p744_p13 }
 0x18e   : > { %1013 = dma.done.wait (%p745_p0), %s542_s5, 256  }
 0x18f   : > { %1015 = vsyncadd (%p745_p0), %s542_s5, 4294967040  ;;  %p21_p5 = scmp.ge.s32.totalorder %s1139_s10, 4   ;;  %s1368_s15 = smov %s1022_s16 }
 0x190   : > { %s1369_s16 = smov %s1026_s17  ;;  %s1370_s17 = smov %s1155_s14 }
 0x191   : > { %s1371_s18 = smov %s1139_s10  ;;  %23 = sbr.rel (!%p21_p5) target bundleno = 12 (0xc), region = 102 }
 0x196   :  { %548 = vsyncpa [#allocation3], 1 }
 0x197   :  { %550 = vsyncpa [#allocation3 + $0x1], 1 }
 0x198   :  { %551 = vsyncpa [#allocation6], 1 }
 0x199   :  { %553 = vsyncpa [#allocation6 + $0x1], 1 }
 0x19a   :  { %554 = vsyncpa [#allocation9], 1 }
 0x19b   :  { %555 = vsyncpa [#allocation4], 1 }
 0x19c   :  { %557 = vsyncpa [#allocation4 + $0x1], 1 }

</bundles_post_ra>
